<compile_context>
chip_gen: v7x
topology: tpu7x:2x2x1
jax: 0.10.0
libtpu: 0.0.40
codegen_flags: <defaults>
</compile_context>

<pallas_src>
import functools

import jax
import jax.numpy as jnp
from jax import lax
from jax.experimental import pallas as pl
from jax.experimental.pallas import tpu as pltpu


# ----------------------------------------------------------------------------
# Fused Pallas kernel: one (batch element) per grid step
# ----------------------------------------------------------------------------
def _fused_attention_kernel(x_ref, ctx_ref, wq_ref, wkv_ref, wo_ref, bo_ref,
                            o_ref, *, heads, dim_head):
    # x:   (n, dim)          ctx: (m, dim)
    # wq:  (dim, inner)      [softmax scale already folded in]
    # wkv: (dim, 2*inner)    wo: (inner, dim)    bo: (1, dim)
    inner = heads * dim_head

    x = x_ref[...]
    ctx = ctx_ref[...]

    # --- projections (MXU, f32 accumulate) ---
    q = jnp.dot(x, wq_ref[...], preferred_element_type=jnp.float32)        # (n, inner)
    kv = jnp.dot(ctx, wkv_ref[...], preferred_element_type=jnp.float32)    # (m, 2*inner)
    k = kv[:, :inner]
    v = kv[:, inner:]

    # --- per-head softmax attention (static Python loop over heads) ---
    contract_last = (((1,), (1,)), ((), ()))
    head_outs = []
    for h in range(heads):
        lo = h * dim_head
        hi = lo + dim_head
        qh = q[:, lo:hi]                                                    # (n, d)
        kh = k[:, lo:hi]                                                    # (m, d)
        vh = v[:, lo:hi]                                                    # (m, d)

        # (n, m) logits; contraction over shared last dim — no k transpose.
        dots = lax.dot_general(qh, kh, contract_last,
                               preferred_element_type=jnp.float32)
        dots = dots - jnp.max(dots, axis=-1, keepdims=True)
        p = jnp.exp(dots)
        s = jnp.sum(p, axis=-1, keepdims=True)
        inv = pl.reciprocal(s, approx=True)         # EUP vrcp (own VLIW slot)
        inv = inv * (2.0 - s * inv)                 # one Newton step -> ~f32 exact
        p = p * inv

        head_outs.append(jnp.dot(p, vh, preferred_element_type=jnp.float32))

    out = jnp.concatenate(head_outs, axis=-1)                               # (n, inner)

    # --- output projection + bias (dropout p=0.0 is identity) ---
    y = jnp.dot(out, wo_ref[...], preferred_element_type=jnp.float32) + bo_ref[...]
    o_ref[...] = y.astype(o_ref.dtype)


# ----------------------------------------------------------------------------
# Wrapper
# ----------------------------------------------------------------------------
def attention_forward(kparams, x, context=None, kv_include_self=False,
                      *, heads, dim_head):
    """x: (b, n, dim); optional context: (b, m, dim). Returns (b, n, dim)."""
    b, n, dim = x.shape
    inner = heads * dim_head

    context = x if context is None else context
    if kv_include_self:
        context = jnp.concatenate((x, context), axis=1)
    m = context.shape[1]

    kernel = functools.partial(_fused_attention_kernel,
                               heads=heads, dim_head=dim_head)

    return pl.pallas_call(
        kernel,
        out_shape=jax.ShapeDtypeStruct((b, n, dim), x.dtype),
        grid=(b,),
        in_specs=[
            pl.BlockSpec((None, n, dim), lambda bi: (bi, 0, 0)),      # x
            pl.BlockSpec((None, m, dim), lambda bi: (bi, 0, 0)),      # context
            pl.BlockSpec((dim, inner), lambda bi: (0, 0)),            # wq (scaled)
            pl.BlockSpec((dim, 2 * inner), lambda bi: (0, 0)),        # wkv
            pl.BlockSpec((inner, dim), lambda bi: (0, 0)),            # wo
            pl.BlockSpec((1, dim), lambda bi: (0, 0)),                # bo
        ],
        out_specs=pl.BlockSpec((None, n, dim), lambda bi: (bi, 0, 0)),
        compiler_params=pltpu.CompilerParams(
            dimension_semantics=("parallel",)),                       # megacore on v7x
    )(x, context, kparams["wq"], kparams["wkv"], kparams["wo"], kparams["bo"])


# ----------------------------------------------------------------------------
# Parameter init (PyTorch nn.Linear layout) + one-time kernel-layout transform
# ----------------------------------------------------------------------------
def init_attention_params(key, dim, heads, dim_head):
    """PyTorch-style weights: (out_features, in_features); uniform ±1/sqrt(fan_in)."""
    inner_dim = dim_head * heads
    k1, k2, k3, k4 = jax.random.split(key, 4)
    bound_q = 1.0 / jnp.sqrt(dim)
    bound_o = 1.0 / jnp.sqrt(inner_dim)
    return {
        "to_q_w": jax.random.uniform(k1, (inner_dim, dim), jnp.float32, -bound_q, bound_q),
        "to_kv_w": jax.random.uniform(k2, (inner_dim * 2, dim), jnp.float32, -bound_q, bound_q),
        "to_out_w": jax.random.uniform(k3, (dim, inner_dim), jnp.float32, -bound_o, bound_o),
        "to_out_b": jax.random.uniform(k4, (dim,), jnp.float32, -bound_o, bound_o),
    }


def prepare_kernel_params(params, dim_head):
    """One-time transform: pre-transpose to (in, out) and fold softmax scale into wq."""
    scale = dim_head ** (-0.5)
    dim = params["to_out_b"].shape[0]
    return {
        "wq": params["to_q_w"].T * scale,          # (dim, inner), scale folded
        "wkv": params["to_kv_w"].T,                # (dim, 2*inner)
        "wo": params["to_out_w"].T,                # (inner, dim)
        "bo": params["to_out_b"].reshape(1, dim),  # (1, dim)
    }


# ----------------------------------------------------------------------------
# Reference (plain JAX, mirrors the PyTorch module exactly)
# ----------------------------------------------------------------------------
def attention_reference(params, x, context=None, kv_include_self=False,
                        *, heads, dim_head):
    b, n, dim = x.shape
    inner_dim = heads * dim_head
    scale = dim_head ** (-0.5)
    context = x if context is None else context
    if kv_include_self:
        context = jnp.concatenate((x, context), axis=1)
    q = x @ params["to_q_w"].T
    kv = context @ params["to_kv_w"].T
    k, v = kv[..., :inner_dim], kv[..., inner_dim:]

    def sh(t):
        return t.reshape(b, -1, heads, dim_head).transpose(0, 2, 1, 3)

    q, k, v = sh(q), sh(k), sh(v)
    dots = jnp.einsum("bhid,bhjd->bhij", q, k) * scale
    attn = jax.nn.softmax(dots, axis=-1)
    out = jnp.einsum("bhij,bhjd->bhid", attn, v)
    out = out.transpose(0, 2, 1, 3).reshape(b, n, inner_dim)
    return out @ params["to_out_w"].T + params["to_out_b"]


# ----------------------------------------------------------------------------
if __name__ == "__main__":
    # Small shapes: batch=2, seq=8, dim=32, heads=2, dim_head=16 (inner_dim=32)
    batch, seq, dim = 2, 8, 32
    heads, dim_head = 2, 16

    key = jax.random.PRNGKey(0)
    kp, kx, kc = jax.random.split(key, 3)
    params = init_attention_params(kp, dim, heads, dim_head)
    kparams = prepare_kernel_params(params, dim_head)
    x = jax.random.normal(kx, (batch, seq, dim), jnp.float32)

    # Self-attention path.
    out1 = attention_forward(kparams, x, heads=heads, dim_head=dim_head)
    out1 = jax.block_until_ready(out1)
    ref1 = attention_reference(params, x, heads=heads, dim_head=dim_head)
    assert out1.shape == (batch, seq, dim)
    # Tolerance 1e-3 accounts for the EUP approx-reciprocal (Newton-refined) path.
    assert jnp.allclose(out1, ref1, atol=1e-3, rtol=1e-3), "self-attn mismatch"

    # Cross-attention path with kv_include_self=True (m = 2*seq).
    ctx = jax.random.normal(kc, (batch, seq, dim), jnp.float32)
    out2 = attention_forward(kparams, x, context=ctx, kv_include_self=True,
                             heads=heads, dim_head=dim_head)
    out2 = jax.block_until_ready(out2)
    ref2 = attention_reference(params, x, context=ctx, kv_include_self=True,
                               heads=heads, dim_head=dim_head)
    assert out2.shape == (batch, seq, dim)
    assert jnp.allclose(out2, ref2, atol=1e-3, rtol=1e-3), "cross-attn mismatch"

    print("KERNEL_OK")
</pallas_src>

<mosaic_0001>
module attributes {stable_mosaic.version = 11 : i64} {
  func.func @_fused_attention_kernel(%arg0: i32, %arg1: memref<1x8x32xf32, #tpu.memory_space<vmem>>, %arg2: memref<1x8x32xf32, #tpu.memory_space<vmem>>, %arg3: memref<32x32xf32, #tpu.memory_space<vmem>>, %arg4: memref<32x64xf32, #tpu.memory_space<vmem>>, %arg5: memref<32x32xf32, #tpu.memory_space<vmem>>, %arg6: memref<1x32xf32, #tpu.memory_space<vmem>>, %arg7: memref<1x8x32xf32, #tpu.memory_space<vmem>>) attributes {dimension_semantics = [#tpu.dimension_semantics<parallel>], iteration_bounds = array<i64: 2>, scalar_prefetch = 0 : i64, scratch_operands = 0 : i64, tpu.core_type = #tpu.core_type<tc>, window_params = [{transform_indices = @transform_0, window_bounds = array<i64: 1, 8, 32>}, {transform_indices = @transform_1, window_bounds = array<i64: 1, 8, 32>}, {pipeline_mode = #tpu.pipeline_mode<synchronous>, transform_indices = @transform_2, window_bounds = array<i64: 32, 32>}, {pipeline_mode = #tpu.pipeline_mode<synchronous>, transform_indices = @transform_3, window_bounds = array<i64: 32, 64>}, {pipeline_mode = #tpu.pipeline_mode<synchronous>, transform_indices = @transform_4, window_bounds = array<i64: 32, 32>}, {pipeline_mode = #tpu.pipeline_mode<synchronous>, transform_indices = @transform_5, window_bounds = array<i64: 1, 32>}, {transform_indices = @transform_6, window_bounds = array<i64: 1, 8, 32>}]} {
    %c0 = arith.constant 0 : index
    %c0_0 = arith.constant 0 : index
    %c0_1 = arith.constant 0 : index
    %0 = vector.load %arg1[%c0, %c0_0, %c0_1] : memref<1x8x32xf32, #tpu.memory_space<vmem>>, vector<1x8x32xf32>
    %1 = vector.shape_cast %0 : vector<1x8x32xf32> to vector<8x32xf32>
    %c0_2 = arith.constant 0 : index
    %c0_3 = arith.constant 0 : index
    %c0_4 = arith.constant 0 : index
    %2 = vector.load %arg2[%c0_2, %c0_3, %c0_4] : memref<1x8x32xf32, #tpu.memory_space<vmem>>, vector<1x8x32xf32>
    %3 = vector.shape_cast %2 : vector<1x8x32xf32> to vector<8x32xf32>
    %c0_5 = arith.constant 0 : index
    %c0_6 = arith.constant 0 : index
    %4 = vector.load %arg3[%c0_5, %c0_6] : memref<32x32xf32, #tpu.memory_space<vmem>>, vector<32x32xf32>
    %cst = arith.constant dense<0.000000e+00> : vector<8x32xf32>
    %5 = tpu.matmul %1, %4, %cst {dimension_numbers = #tpu.dot_dimension_numbers<[1], [0], [0], [1], [0, 0, 1, 1], [], []>} : vector<8x32xf32>, vector<32x32xf32>, vector<8x32xf32> -> vector<8x32xf32>
    %c0_7 = arith.constant 0 : index
    %c0_8 = arith.constant 0 : index
    %6 = vector.load %arg4[%c0_7, %c0_8] : memref<32x64xf32, #tpu.memory_space<vmem>>, vector<32x64xf32>
    %cst_9 = arith.constant dense<0.000000e+00> : vector<8x64xf32>
    %7 = tpu.matmul %3, %6, %cst_9 {dimension_numbers = #tpu.dot_dimension_numbers<[1], [0], [0], [1], [0, 0, 1, 1], [], []>} : vector<8x32xf32>, vector<32x64xf32>, vector<8x64xf32> -> vector<8x64xf32>
    %8 = vector.extract_strided_slice %7 {offsets = [0, 0], sizes = [8, 32], strides = [1, 1]} : vector<8x64xf32> to vector<8x32xf32>
    %9 = vector.extract_strided_slice %7 {offsets = [0, 32], sizes = [8, 32], strides = [1, 1]} : vector<8x64xf32> to vector<8x32xf32>
    %10 = vector.extract_strided_slice %5 {offsets = [0, 0], sizes = [8, 16], strides = [1, 1]} : vector<8x32xf32> to vector<8x16xf32>
    %11 = vector.extract_strided_slice %8 {offsets = [0, 0], sizes = [8, 16], strides = [1, 1]} : vector<8x32xf32> to vector<8x16xf32>
    %12 = vector.extract_strided_slice %9 {offsets = [0, 0], sizes = [8, 16], strides = [1, 1]} : vector<8x32xf32> to vector<8x16xf32>
    %cst_10 = arith.constant dense<0.000000e+00> : vector<8x8xf32>
    %13 = tpu.matmul %10, %11, %cst_10 {dimension_numbers = #tpu.dot_dimension_numbers<[1], [1], [0], [0], [0, 0, 1, 0], [], []>} : vector<8x16xf32>, vector<8x16xf32>, vector<8x8xf32> -> vector<8x8xf32>
    %cst_11 = arith.constant dense<0xFF800000> : vector<8xf32>
    %14 = vector.multi_reduction <maximumf>, %13, %cst_11 [1] : vector<8x8xf32> to vector<8xf32>
    %15 = vector.shape_cast %14 : vector<8xf32> to vector<8x1xf32>
    %16 = vector.broadcast %15 : vector<8x1xf32> to vector<8x8xf32>
    %17 = arith.subf %13, %16 : vector<8x8xf32>
    %18 = math.exp %17 : vector<8x8xf32>
    %cst_12 = arith.constant dense<0.000000e+00> : vector<8xf32>
    %19 = vector.multi_reduction <add>, %18, %cst_12 [1] : vector<8x8xf32> to vector<8xf32>
    %20 = vector.shape_cast %19 : vector<8xf32> to vector<8x1xf32>
    %21 = tpu.reciprocal %20 {approx = true} : vector<8x1xf32> -> vector<8x1xf32>
    %22 = arith.mulf %20, %21 : vector<8x1xf32>
    %cst_13 = arith.constant 2.000000e+00 : f32
    %23 = vector.broadcast %cst_13 : f32 to vector<8x1xf32>
    %24 = arith.subf %23, %22 : vector<8x1xf32>
    %25 = arith.mulf %21, %24 : vector<8x1xf32>
    %26 = vector.broadcast %25 : vector<8x1xf32> to vector<8x8xf32>
    %27 = arith.mulf %18, %26 : vector<8x8xf32>
    %cst_14 = arith.constant dense<0.000000e+00> : vector<8x16xf32>
    %28 = tpu.matmul %27, %12, %cst_14 {dimension_numbers = #tpu.dot_dimension_numbers<[1], [0], [0], [1], [0, 0, 1, 1], [], []>} : vector<8x8xf32>, vector<8x16xf32>, vector<8x16xf32> -> vector<8x16xf32>
    %29 = vector.extract_strided_slice %5 {offsets = [0, 16], sizes = [8, 16], strides = [1, 1]} : vector<8x32xf32> to vector<8x16xf32>
    %30 = vector.extract_strided_slice %8 {offsets = [0, 16], sizes = [8, 16], strides = [1, 1]} : vector<8x32xf32> to vector<8x16xf32>
    %31 = vector.extract_strided_slice %9 {offsets = [0, 16], sizes = [8, 16], strides = [1, 1]} : vector<8x32xf32> to vector<8x16xf32>
    %cst_15 = arith.constant dense<0.000000e+00> : vector<8x8xf32>
    %32 = tpu.matmul %29, %30, %cst_15 {dimension_numbers = #tpu.dot_dimension_numbers<[1], [1], [0], [0], [0, 0, 1, 0], [], []>} : vector<8x16xf32>, vector<8x16xf32>, vector<8x8xf32> -> vector<8x8xf32>
    %cst_16 = arith.constant dense<0xFF800000> : vector<8xf32>
    %33 = vector.multi_reduction <maximumf>, %32, %cst_16 [1] : vector<8x8xf32> to vector<8xf32>
    %34 = vector.shape_cast %33 : vector<8xf32> to vector<8x1xf32>
    %35 = vector.broadcast %34 : vector<8x1xf32> to vector<8x8xf32>
    %36 = arith.subf %32, %35 : vector<8x8xf32>
    %37 = math.exp %36 : vector<8x8xf32>
    %cst_17 = arith.constant dense<0.000000e+00> : vector<8xf32>
    %38 = vector.multi_reduction <add>, %37, %cst_17 [1] : vector<8x8xf32> to vector<8xf32>
    %39 = vector.shape_cast %38 : vector<8xf32> to vector<8x1xf32>
    %40 = tpu.reciprocal %39 {approx = true} : vector<8x1xf32> -> vector<8x1xf32>
    %41 = arith.mulf %39, %40 : vector<8x1xf32>
    %cst_18 = arith.constant 2.000000e+00 : f32
    %42 = vector.broadcast %cst_18 : f32 to vector<8x1xf32>
    %43 = arith.subf %42, %41 : vector<8x1xf32>
    %44 = arith.mulf %40, %43 : vector<8x1xf32>
    %45 = vector.broadcast %44 : vector<8x1xf32> to vector<8x8xf32>
    %46 = arith.mulf %37, %45 : vector<8x8xf32>
    %cst_19 = arith.constant dense<0.000000e+00> : vector<8x16xf32>
    %47 = tpu.matmul %46, %31, %cst_19 {dimension_numbers = #tpu.dot_dimension_numbers<[1], [0], [0], [1], [0, 0, 1, 1], [], []>} : vector<8x8xf32>, vector<8x16xf32>, vector<8x16xf32> -> vector<8x16xf32>
    %48 = tpu.concatenate %28, %47 in 1 : vector<8x16xf32>, vector<8x16xf32> -> vector<8x32xf32>
    %c0_20 = arith.constant 0 : index
    %c0_21 = arith.constant 0 : index
    %49 = vector.load %arg5[%c0_20, %c0_21] : memref<32x32xf32, #tpu.memory_space<vmem>>, vector<32x32xf32>
    %cst_22 = arith.constant dense<0.000000e+00> : vector<8x32xf32>
    %50 = tpu.matmul %48, %49, %cst_22 {dimension_numbers = #tpu.dot_dimension_numbers<[1], [0], [0], [1], [0, 0, 1, 1], [], []>} : vector<8x32xf32>, vector<32x32xf32>, vector<8x32xf32> -> vector<8x32xf32>
    %c0_23 = arith.constant 0 : index
    %c0_24 = arith.constant 0 : index
    %51 = vector.load %arg6[%c0_23, %c0_24] : memref<1x32xf32, #tpu.memory_space<vmem>>, vector<1x32xf32>
    %52 = vector.broadcast %51 : vector<1x32xf32> to vector<8x32xf32>
    %53 = arith.addf %50, %52 : vector<8x32xf32>
    %c0_25 = arith.constant 0 : index
    %c0_26 = arith.constant 0 : index
    %c0_27 = arith.constant 0 : index
    %54 = vector.load %arg7[%c0_25, %c0_26, %c0_27] : memref<1x8x32xf32, #tpu.memory_space<vmem>>, vector<1x8x32xf32>
    %55 = vector.shape_cast %54 : vector<1x8x32xf32> to vector<8x32xf32>
    %56 = vector.shape_cast %53 : vector<8x32xf32> to vector<1x8x32xf32>
    tpu.vector_store %arg7[%c0_25, %c0_26, %c0_27], %56 {strides = array<i32>} : memref<1x8x32xf32, #tpu.memory_space<vmem>>, vector<1x8x32xf32>,
    return
  }
  func.func @transform_0(%arg0: i32) -> (i32, i32, i32) {
    %c0_i32 = arith.constant 0 : i32
    %c0_i32_0 = arith.constant 0 : i32
    %c0_i32_1 = arith.constant 0 : i32
    return %arg0, %c0_i32, %c0_i32_0 : i32, i32, i32
  }
  func.func @transform_1(%arg0: i32) -> (i32, i32, i32) {
    %c0_i32 = arith.constant 0 : i32
    %c0_i32_0 = arith.constant 0 : i32
    %c0_i32_1 = arith.constant 0 : i32
    return %arg0, %c0_i32, %c0_i32_0 : i32, i32, i32
  }
  func.func @transform_2(%arg0: i32) -> (i32, i32) {
    %c0_i32 = arith.constant 0 : i32
    %c0_i32_0 = arith.constant 0 : i32
    %c0_i32_1 = arith.constant 0 : i32
    return %c0_i32, %c0_i32_0 : i32, i32
  }
  func.func @transform_3(%arg0: i32) -> (i32, i32) {
    %c0_i32 = arith.constant 0 : i32
    %c0_i32_0 = arith.constant 0 : i32
    %c0_i32_1 = arith.constant 0 : i32
    return %c0_i32, %c0_i32_0 : i32, i32
  }
  func.func @transform_4(%arg0: i32) -> (i32, i32) {
    %c0_i32 = arith.constant 0 : i32
    %c0_i32_0 = arith.constant 0 : i32
    %c0_i32_1 = arith.constant 0 : i32
    return %c0_i32, %c0_i32_0 : i32, i32
  }
  func.func @transform_5(%arg0: i32) -> (i32, i32) {
    %c0_i32 = arith.constant 0 : i32
    %c0_i32_0 = arith.constant 0 : i32
    %c0_i32_1 = arith.constant 0 : i32
    return %c0_i32, %c0_i32_0 : i32, i32
  }
  func.func @transform_6(%arg0: i32) -> (i32, i32, i32) {
    %c0_i32 = arith.constant 0 : i32
    %c0_i32_0 = arith.constant 0 : i32
    %c0_i32_1 = arith.constant 0 : i32
    return %arg0, %c0_i32, %c0_i32_0 : i32, i32, i32
  }
}

</mosaic_0001>

<bundles_post_ra>
// kernel: tpu_custom_call.1
= control target key start
LH: loop header
LB: loop body
LE: loop exit
PB: predicated region body
PF: predicated region fallthrough
CT: control target
= control target key end

     0   :  { %s1911_s0 = inlined_call_operand.hbm [shape: f32[2,8,32], index: 0, kind: input, shape index: {}]   ;;  %s1912_s1 = inlined_call_operand.hbm [shape: f32[2,8,32], index: 1, kind: input, shape index: {}]   ;;  %s1913_s2 = inlined_call_operand.hbm [shape: f32[32,32], index: 2, kind: input, shape index: {}]   ;;  %s1914_s3 = inlined_call_operand.hbm [shape: f32[32,64], index: 3, kind: input, shape index: {}]   ;;  %s1915_s4 = inlined_call_operand.hbm [shape: f32[32,32], index: 4, kind: input, shape index: {}]   ;;  %s1916_s5 = inlined_call_operand.vmem [shape: f32[1,32], index: 5, kind: input, shape index: {}]   ;;  %s1917_s6 = inlined_call_operand.hbm [shape: f32[2,8,32], index: 6, kind: output, shape index: {}]  }
   0x1   :  { %1922 = sst [smem:[#allocation17_spill]] %s1913_s2 }
   0x2   :  { %1923 = sst [smem:[#allocation18_spill]] %s1914_s3 }
   0x3   :  { %1924 = sst [smem:[#allocation19_spill]] %s1915_s4 }
   0x4   :  { %11 = vsyncpa [#allocation3], 0 }
   0x5   :  { %13 = vsyncpa [#allocation3 + $0x1], 0 }
   0x6   :  { %14 = vsyncpa [#allocation6], 0 }
   0x7   :  { %16 = vsyncpa [#allocation6 + $0x1], 0 }
   0x8   :  { %17 = vsyncpa [#allocation9], 0 }
   0x9   :  { %18 = vsyncpa [#allocation4], 0 }
   0xa   :  { %20 = vsyncpa [#allocation4 + $0x1], 0  ;;  %s1563_s21 = smov 0   ;;  %s1565_s22 = smov 0  }
   0xb   :  { %s1567_s23 = smov 0   ;;  %s1569_s24 = smov 0  }
   0xc LB: > { %s1584_s25 = sadd.s32 4294967295, %s1511_s24   ;;  %s1065_s26 = sadd.s32 4294967294, %s1511_s24   ;;  %s1511_s24 = sphi %s1569_s24, %s1948_s24   ;;  %s1507_s23 = sphi %s1567_s23, %s1947_s23   ;;  %s1503_s22 = sphi %s1565_s22, %s1946_s22   ;;  %s1499_s21 = sphi %s1563_s21, %s1945_s21  }
   0xd   : > { %p46_p0 = scmp.ne.s32.totalorder %s1503_s22, %s1499_s21  ;;  %p1918_p1 = scmp.eq.s32.totalorder %s1584_s25, 0 }
   0xe   : > { %p186_p3 = scmp.eq.s32.totalorder %s1065_s26, 1  ;;  %p1066_p5 = scmp.ge.s32.totalorder %s1511_s24, 1 }
   0xf   : > { %p1593_p4 = por %p1918_p1, %p46_p0  ;;  %p193_p7 = scmp.lt.s32.totalorder %s1511_s24, 3 }
  0x10   : > { %p1598_p6 = por %p186_p3, %p46_p0  ;;  %s1513_s30 = smov [#allocation7]  }
  0x11   : > { %s1925_s27 = scalar_select %p1593_p4, 1, 0 }
  0x12   : > { %s1926_s28 = scalar_select %p1598_p6, 1, 0 }
  0x13   : > { %p1603_p8 = pnand %p1066_p5, %p193_p7  ;;  %s205_s7 = sshll.u32 %s1513_s30, 4  ;;  %s1607_s7 = int_to_ptr.vmem [resolvable:$true] %s205_s7 }
  0x14   : > { %s1514_s9 = smov [#allocation8]   ;;  %s1515_s11 = smov [#allocation10]  }
  0x15   : > { %s1927_s29 = scalar_select %p1603_p8, 1, 0 }
  0x16   : > { %p1208_p9 = pneg %p1603_p8  ;;  %s218_s10 = sshll.u32 %s1514_s9, 4  ;;  %s1618_s10 = int_to_ptr.vmem [resolvable:$true] %s218_s10 }
  0x17   : > { %s1620_s12 = sshll.u32 %s1515_s11, 4  ;;  %s1929_s2 = sld [smem:[#allocation17_spill]]  ;;  %s232_s12 = int_to_ptr.vmem [resolvable:$true] %s1620_s12 }
  0x18   : > { %p1614_p11 = pnand %p1208_p9, %p1918_p1 }
  0x1a   : > { %p1630_p13 = pneg %p1614_p11 }
  0x1d   : > { %s1289_s15 = scalar_lea.hbm %s1929_s2, 512 }
  0x1e   : > { %p1290_p12 = scmp.ne.s32.totalorder %s1929_s2, %s1289_s15  ;;  %p1296_p5 = scmp.lt.u32.totalorder %s1289_s15, %s1929_s2 }
  0x20   : > { %p1292_p0 = pnand %p1630_p13, %p1290_p12 }
  0x22   : > { %p1293_p3 = pneg %p1292_p0 }
  0x24   : > { %p1298_p7 = pnand %p1296_p5, %p1293_p3 }
  0x26   : > { %1301 = shalt.err (!%p1298_p7)
}
  0x27   : > { %s1302_s26 = scalar_lea.vmem %s1607_s7, 512  ;;  %p1310_p2 = scmp.lt.s32.totalorder %s1607_s7, %s1607_s7 }
  0x28   : > { %p1303_p9 = scmp.ne.s32.totalorder %s1607_s7, %s1302_s26  ;;  %p1311_p6 = scmp.lt.s32.totalorder %s1302_s26, %s1302_s26 }
  0x2a   : > { %p1305_p10 = pnand %p1303_p9, %p1630_p13  ;;  %p1312_p12 = por %p1311_p6, %p1310_p2 }
  0x2c   : > { %p1306_p1 = pneg %p1305_p10 }
  0x2e   : > { %p1313_p0 = pnand %p1312_p12, %p1306_p1 }
  0x30   : > { %1316 = shalt.err (!%p1313_p0)
}
  0x31   : > { %s1516_s30 = smov 128   ;;  %s1517_s9 = smov 8  }
  0x32   : > { %1211 = dma.hbm_to_vmem [thread:$0]  (!%p1614_p11), %s1929_s2, 512, %s1607_s7, [#allocation6], %s1516_s30, %s1516_s30, %s1517_s9  }
  0x33   : > { %s1931_s3 = sld [smem:[#allocation18_spill]] }
  0x39   : > { %s1317_s16 = scalar_lea.hbm %s1931_s3, 512 }
  0x3a   : > { %p1318_p1 = scmp.ne.s32.totalorder %s1931_s3, %s1317_s16  ;;  %p1324_p10 = scmp.lt.u32.totalorder %s1317_s16, %s1931_s3 }
  0x3c   : > { %p1320_p2 = pnand %p1318_p1, %p1630_p13 }
  0x3e   : > { %p1321_p6 = pneg %p1320_p2 }
  0x40   : > { %p1326_p3 = pnand %p1324_p10, %p1321_p6 }
  0x42   : > { %1329 = shalt.err (!%p1326_p3)
}
  0x43   : > { %s1330_s7 = scalar_lea.vmem %s1618_s10, 512  ;;  %p1338_p12 = scmp.lt.s32.totalorder %s1618_s10, %s1618_s10 }
  0x44   : > { %p1331_p5 = scmp.ne.s32.totalorder %s1618_s10, %s1330_s7  ;;  %p1339_p0 = scmp.lt.s32.totalorder %s1330_s7, %s1330_s7 }
  0x46   : > { %p1333_p7 = pnand %p1331_p5, %p1630_p13  ;;  %p1340_p1 = por %p1339_p0, %p1338_p12 }
  0x48   : > { %p1334_p9 = pneg %p1333_p7 }
  0x4a   : > { %p1341_p2 = pnand %p1340_p1, %p1334_p9 }
  0x4c   : > { %1344 = shalt.err (!%p1341_p2)
}
  0x4d   : > { %1214 = dma.hbm_to_vmem [thread:$0]  (!%p1614_p11), %s1931_s3, 512, %s1618_s10, [#allocation9], %s1516_s30, %s1516_s30, %s1517_s9  }
  0x4e   : > { %s1932_s4 = sld [smem:[#allocation19_spill]] }
  0x54   : > { %s1345_s16 = scalar_lea.hbm %s1932_s4, 512 }
  0x55   : > { %p1346_p6 = scmp.ne.s32.totalorder %s1932_s4, %s1345_s16  ;;  %p1352_p5 = scmp.lt.u32.totalorder %s1345_s16, %s1932_s4 }
  0x57   : > { %p1348_p10 = pnand %p1346_p6, %p1630_p13 }
  0x59   : > { %p1349_p3 = pneg %p1348_p10 }
  0x5b   : > { %p1354_p7 = pnand %p1352_p5, %p1349_p3 }
  0x5d   : > { %1357 = shalt.err (!%p1354_p7)
}
  0x5e   : > { %s1358_s7 = scalar_lea.vmem %s232_s12, 512  ;;  %p1366_p1 = scmp.lt.s32.totalorder %s232_s12, %s232_s12 }
  0x5f   : > { %p1359_p9 = scmp.ne.s32.totalorder %s232_s12, %s1358_s7  ;;  %p1367_p2 = scmp.lt.s32.totalorder %s1358_s7, %s1358_s7 }
  0x61   : > { %p1361_p12 = pnand %p1359_p9, %p1630_p13  ;;  %p1368_p4 = por %p1367_p2, %p1366_p1 }
  0x63   : > { %p1362_p0 = pneg %p1361_p12 }
  0x65   : > { %p1369_p8 = pnand %p1368_p4, %p1362_p0 }
  0x67   : > { %1372 = shalt.err (!%p1369_p8)
}
  0x68   : > { %1217 = dma.hbm_to_vmem [thread:$0]  (!%p1614_p11), %s1932_s4, 512, %s232_s12, [#allocation9], %s1516_s30, %s1516_s30, %s1517_s9  }
  0x69   : > { %s1703_s18 = sadd.s32 1, %s1511_s24   ;;  %s33_s13 = sadd.s32 1, %s1507_s23 }
  0x6a   : > { %s30_s8 = ssub.s32 %s1511_s24, %s1703_s18  ;;  %p40_p8 = scmp.ne.s32.totalorder %s1507_s23, %s1503_s22 }
  0x6b   : > { %p31_p4 = scmp.eq.s32.totalorder %s30_s8, 0  ;;  %p41_p13 = scmp.eq.s32.totalorder %s1511_s24, 0 }
  0x6c   : > { %p1232_p6 = scmp.lt.s32.totalorder %s1511_s24, 2  ;;  %p1933_p3 = scmp.eq.s32.totalorder %s1584_s25, 1 }
  0x6d   : > { %s1713_s14 = scalar_select %p31_p4, %s1507_s23, %s33_s13  }
  0x6e   : > { %p42_p10 = por %p41_p13, %p40_p8  ;;  %p1717_p5 = por %p1933_p3, %p40_p8 }
  0x6f   : > { %s248_s16 = sand.u32 1, %s1507_s23   ;;  %s1072_s17 = sshll.u32 %s1511_s24, 7 }
  0x70   : > { %s1934_s15 = scalar_select %p1717_p5, 1, 0 }
  0x71   : > { %s1723_s12 = sshll.u32 %s248_s16, 3  ;;  %s1728_s19 = scalar_lea.hbm %s1911_s0, %s1072_s17 }
  0x72   : > { %s252_s20 = scalar_lea.vmem [#allocation2], %s1723_s12  ;;  %p1731_p11 = pnand %p1232_p6, %p42_p10 }
  0x73   : > { %s259_s26 = sshll.u32 %s252_s20, 4  ;;  %s1740_s8 = scalar_lea.hbm %s1912_s1, %s1072_s17  ;;  %s1735_s26 = int_to_ptr.vmem [resolvable:$true] %s259_s26 }
  0x74   : > { %s249_s13 = scalar_lea.sflag [#allocation3], %s248_s16  ;;  %s1373_s30 = scalar_lea.hbm %s1728_s19, 128 }
  0x75   : > { %p1374_p7 = scmp.ne.s32.totalorder %s1728_s19, %s1373_s30  ;;  %p1375_p9 = pneg %p1731_p11 }
  0x76   : > { %s1378_s2 = scalar_lea.hbm %s1911_s0, 256  ;;  %p1379_p1 = scmp.lt.u32.totalorder %s1728_s19, %s1911_s0 }
  0x77   : > { %p1376_p12 = pnand %p1375_p9, %p1374_p7  ;;  %p1380_p2 = scmp.lt.u32.totalorder %s1378_s2, %s1373_s30 }
  0x78   : > { %p1382_p8 = scmp.lt.u32.totalorder %s1373_s30, %s1728_s19 }
  0x79   : > { %p1377_p0 = pneg %p1376_p12  ;;  %p1381_p4 = por %p1380_p2, %p1379_p1 }
  0x7b   : > { %p1383_p13 = por %p1382_p8, %p1381_p4 }
  0x7d   : > { %p1384_p6 = pnand %p1383_p13, %p1377_p0 }
  0x7f   : > { %1387 = shalt.err (!%p1384_p6)
}
  0x80   : > { %s1388_s16 = scalar_lea.vmem %s1735_s26, 128  ;;  %s1518_s17 = smov [#allocation2]  }
  0x81   : > { %p1389_p10 = scmp.ne.s32.totalorder %s1735_s26, %s1388_s16  ;;  %s1393_s10 = sshll.u32 %s1518_s17, 4  ;;  %s1394_s10 = int_to_ptr.vmem [resolvable:$false] %s1393_s10 }
  0x82   : > { %s1395_s3 = scalar_lea.vmem %s1394_s10, 256  ;;  %p1396_p12 = scmp.lt.s32.totalorder %s1735_s26, %s1394_s10 }
  0x83   : > { %p1391_p3 = pnand %p1389_p10, %p1375_p9  ;;  %p1397_p1 = scmp.lt.s32.totalorder %s1395_s3, %s1388_s16 }
  0x85   : > { %p1392_p7 = pneg %p1391_p3  ;;  %p1398_p2 = por %p1397_p1, %p1396_p12 }
  0x87   : > { %p1399_p4 = pnand %p1398_p2, %p1392_p7 }
  0x89   : > { %1402 = shalt.err (!%p1399_p4)
}
  0x8a   : > { %1221 = dma.hbm_to_vmem [thread:$0]  (!%p1731_p11), %s1728_s19, 128, %s1735_s26, %s249_s13  }
  0x8b   : > { %s266_s2 = sand.u32 1, %s1511_s24   ;;  %s270_s4 = scalar_lea.vmem [#allocation5], %s1723_s12 }
  0x8c   : > { %s277_s11 = sshll.u32 %s270_s4, 4  ;;  %s267_s30 = scalar_lea.sflag [#allocation6], %s266_s2  ;;  %s278_s11 = int_to_ptr.vmem [resolvable:$true] %s277_s11 }
  0x8d   : > { %s1403_s9 = scalar_lea.hbm %s1740_s8, 128  ;;  %s1408_s17 = scalar_lea.hbm %s1912_s1, 256 }
  0x8e   : > { %p1404_p0 = scmp.ne.s32.totalorder %s1740_s8, %s1403_s9  ;;  %p1409_p6 = scmp.lt.u32.totalorder %s1740_s8, %s1912_s1 }
  0x8f   : > { %p1410_p10 = scmp.lt.u32.totalorder %s1408_s17, %s1403_s9  ;;  %p1412_p7 = scmp.lt.u32.totalorder %s1403_s9, %s1740_s8 }
  0x90   : > { %p1406_p8 = pnand %p1404_p0, %p1375_p9 }
  0x91   : > { %p1411_p3 = por %p1410_p10, %p1409_p6 }
  0x92   : > { %p1407_p13 = pneg %p1406_p8 }
  0x93   : > { %p1413_p12 = por %p1412_p7, %p1411_p3 }
  0x95   : > { %p1414_p1 = pnand %p1413_p12, %p1407_p13 }
  0x97   : > { %1417 = shalt.err (!%p1414_p1)
}
  0x98   : > { %s1418_s12 = scalar_lea.vmem %s278_s11, 128  ;;  %s1519_s19 = smov [#allocation5]  }
  0x99   : > { %p1419_p2 = scmp.ne.s32.totalorder %s278_s11, %s1418_s12  ;;  %s1423_s26 = sshll.u32 %s1519_s19, 4  ;;  %s1424_s26 = int_to_ptr.vmem [resolvable:$false] %s1423_s26 }
  0x9a   : > { %s1425_s13 = scalar_lea.vmem %s1424_s26, 256  ;;  %p1426_p8 = scmp.lt.s32.totalorder %s278_s11, %s1424_s26 }
  0x9b   : > { %p1421_p4 = pnand %p1419_p2, %p1375_p9  ;;  %p1427_p5 = scmp.lt.s32.totalorder %s1425_s13, %s1418_s12 }
  0x9d   : > { %p1422_p0 = pneg %p1421_p4  ;;  %p1428_p6 = por %p1427_p5, %p1426_p8 }
  0x9f   : > { %p1429_p10 = pnand %p1428_p6, %p1422_p0 }
  0xa1   : > { %1432 = shalt.err (!%p1429_p10)
}
  0xa2   : > { %1224 = dma.hbm_to_vmem [thread:$0]  (!%p1731_p11), %s1740_s8, 128, %s278_s11, %s267_s30  }
  0xa3   : > { %p1936_p13 = scmp.ne.s32.totalorder %s1927_s29, 0 }
  0xa4   : > { %s1791_s2 = sand.u32 (!%p1936_p13), 1, %s1503_s22   ;;  %p1937_p5 = scmp.ne.s32.totalorder (!%p1936_p13), %s1925_s27, 0 }
  0xa5   : > { %286 = sbr.rel (%p1936_p13) target bundleno = 1612 (0x64c), region = 44  ;;  %s1794_s4 = sshll.u32 (!%p1936_p13), %s1791_s2, 3 }
  0xa6   : > { %s289_s9 = scalar_lea.sflag (!%p1936_p13), [#allocation3], %s1791_s2  ;;  %s292_s20 = scalar_lea.vmem (!%p1936_p13), [#allocation2], %s1794_s4 }
  0xac   : > { %1478 = dma.done.wait (%p1937_p5), %s289_s9, 128  }
  0xad   : > { %1480 = vsyncadd (%p1937_p5), %s289_s9, 4294967168  ;;  %s297_s29 = sand.u32 1, %s1584_s25   ;;  %s301_s8 = scalar_lea.vmem [#allocation5], %s1794_s4 }
  0xae   : > { %s298_s7 = scalar_lea.sflag [#allocation6], %s297_s29 }
  0xaf   : > { %1482 = dma.done.wait (%p1937_p5), %s298_s7, 128  }
  0xb0   : > { %1484 = vsyncadd (%p1937_p5), %s298_s7, 4294967168  ;;  %p1938_p11 = scmp.eq.s32.totalorder %s1584_s25, 0 }
  0xb2   : > { %1486 = dma.done.wait (%p1938_p11), [#allocation6], 512   ;;  %p1939_p9 = pmov %p1938_p11 }
  0xb4   : > { %1488 = vsyncadd (%p1939_p9), [#allocation6], 4294966784  ;;  %p1940_p3 = pmov %p1939_p9 }
  0xb6   : > { %1490 = dma.done.wait (%p1940_p3), [#allocation9], 1024   ;;  %p1941_p7 = pmov %p1940_p3 }
  0xb7   : > { %v1520_v0 = vmov 0.0|0.0   ;;  %vm1521_vm0 = vmmov 0   ;;  %v1522_v1 = vmov 0.0   ;;  %v427_v2 = vld [vmem:[#allocation8] sm:$0xff]  ;;  %v428_v3 = vld [vmem:[#allocation8 + $0x8] sm:$0xff]  ;;  %v429_v7 = vld [vmem:[#allocation8 + $0x10] sm:$0xff] }
  0xb8   : > { %1492 = vsyncadd (%p1941_p7), [#allocation9], 4294966272  ;;  %1178 = vmatprep.subr.bf16.mxu1 %v1520_v0  ;;  %1172 = vmatprep.subr.bf16.mxu0 %v1520_v0  ;;  %v349_v4 = vld [vmem:[#allocation7] sm:$0xff]  ;;  %v1179_v5 = vpack.c.bf16 %v428_v3, %v427_v2  ;;  %v350_v6 = vld [vmem:[#allocation7 + $0x8] sm:$0xff]  ;;  %vm353_vm1 = vcmask 261120   ;;  %vm504_vm2 = vcmask 130048  }
  0xb9   : > { %1138 = vmatprep.mubr.msk.f32.mxu1 %vm1521_vm0, %v1522_v1  ;;  %1127 = vmatprep.mubr.msk.f32.mxu0 %vm1521_vm0, %v1522_v1  ;;  %v430_v8 = vld [vmem:[#allocation8 + $0x18] sm:$0xff]  ;;  %v1173_v9 = vpack.c.bf16 %v350_v6, %v349_v4  ;;  %v351_v10 = vld [vmem:[#allocation7 + $0x10] sm:$0xff]  ;;  %v347_v15 = vld [vmem:[%s292_s20] sm:$0xff]  ;;  %s1523_s27 = smov 112   ;;  %vm581_vm3 = vcmask 64512   ;;  %s1524_s11 = smov 96  }
  0xba   : > { %v352_v11 = vld [vmem:[#allocation7 + $0x18] sm:$0xff]  ;;  %1180 = vmatpush3.bf16.msra.mxu1 %v1179_v5  ;;  %v1182_v12 = vpack.c.bf16 %v430_v8, %v429_v7  ;;  %s1525_s30 = smov 80   ;;  %v845_v52 = vld [vmem:[#allocation10] sm:$0xff]  ;;  %v846_v53 = vld [vmem:[#allocation10 + $0x8] sm:$0xff]  ;;  %s1526_s16 = smov 16  }
  0xbb   : > { %1174 = vmatpush3.bf16.msra.mxu0 %v1173_v9  ;;  %1181 = vmatprep.subr.bf16.mxu1 %v1520_v0  ;;  %v1176_v13 = vpack.c.bf16 %v352_v11, %v351_v10  ;;  %v348_v14 = vld [vmem:[%s301_s8] sm:$0xff]  ;;  %v1185_v55 = vpack.c.bf16 %v846_v53, %v845_v52  ;;  %s1093_s3 = sshll.u32 %s1584_s25, 7  ;;  %s346_s12 = scalar_lea.vmem [#allocation11], %s1794_s4 }
  0xbc   : > { %1175 = vmatprep.subr.bf16.mxu0 %v1520_v0  ;;  %v847_v54 = vld [vmem:[#allocation10 + $0x10] sm:$0xff]  ;;  %v848_v56 = vld [vmem:[#allocation10 + $0x18] sm:$0xff]  ;;  %s944_s19 = sshll.u32 %s346_s12, 4  ;;  %s1866_s9 = scalar_lea.hbm %s1917_s6, %s1093_s3  ;;  %s1868_s19 = int_to_ptr.vmem [resolvable:$true] %s944_s19 }
  0xbd   : > { %v1188_v57 = vpack.c.bf16 %v848_v56, %v847_v54  ;;  %s931_s20 = scalar_lea.sflag [#allocation4], %s1791_s2  ;;  %s1433_s29 = scalar_lea.vmem %s1868_s19, 128 }
  0xbe   : > { %1183 = vmatpush3.bf16.msra.mxu1 %v1182_v12  ;;  %p1434_p12 = scmp.ne.s32.totalorder %s1868_s19, %s1433_s29  ;;  %p1942_p1 = scmp.ne.s32.totalorder %s1934_s15, 0 }
  0xbf   : > { %1177 = vmatpush3.bf16.msra.mxu0 %v1176_v13  ;;  %1141 = vmatprep.subr.mxu1 %v1522_v1  ;;  %s1527_s25 = smov [#allocation11]  }
  0xc0   : > { %1151 = vmatprep.subr.mxu0 %v1522_v1  ;;  %p1435_p2 = pnand %p1434_p12, %p1942_p1  ;;  %s1437_s4 = sshll.u32 %s1527_s25, 4  ;;  %s1438_s4 = int_to_ptr.vmem [resolvable:$false] %s1437_s4 }
  0xc1   : > { %1139 = vmatmul.mubr.msk.f32.vlgmr.msra.gmra.mrb[0].mxu1 %vm353_vm1, %v348_v14  ;;  %s1439_s7 = scalar_lea.vmem %s1438_s4, 256  ;;  %p1440_p0 = scmp.lt.s32.totalorder %s1868_s19, %s1438_s4 }
  0xc2   : > { %1128 = vmatmul.mubr.msk.f32.vlgmr.msra.gmra.mrb[0].mxu0 %vm353_vm1, %v347_v15  ;;  %1143 = vmatprep.mubr.msk.f32.mxu1 %vm1521_vm0, %v1522_v1  ;;  %p1436_p4 = pneg %p1435_p2  ;;  %p1441_p8 = scmp.lt.s32.totalorder %s1439_s7, %s1433_s29 }
  0xc3   : > { %1153 = vmatprep.mubr.msk.f32.mxu0 %vm1521_vm0, %v1522_v1 }
  0xc4   : > { %p1442_p6 = por %p1441_p8, %p1440_p0 }
  0xc6   : > { %p1443_p10 = pnand %p1442_p6, %p1436_p4 }
 0x194   : > { %v500_v16 = vpop.f32.mrb[0].mxu1 }
 0x195   : > { %674 = vrot.lane.b32.xlu0 %v500_v16, %s1523_s27  ;;  %v1140_v17 = vpop.f32.mrb[1].mxu1  ;;  %1142 = vmatpush3.xpose.msk.msra.mxu1 %vm504_vm2, %v500_v16  ;;  %v423_v18 = vpop.f32.mrb[0].mxu0 }
 0x196   : > { %v1129_v19 = vpop.f32.mrb[1].mxu0  ;;  %1146 = vmatprep.subr.mxu1 %v1522_v1 }
 0x198   : > { %1144 = vmatmul.mubr.msk.f32.vlgmr.msra.gmra.mrb[2].mxu1 %vm504_vm2, %v423_v18 }
 0x199   : > { %672 = vrot.lane.b32.xlu0 %v423_v18, %s1523_s27  ;;  %1148 = vmatprep.mubr.msk.f32.mxu1 %vm1521_vm0, %v1522_v1 }
 0x207   : > { %v675_v20 = vpop.permute.xlu0 %674 }
 0x208   : > { %1152 = vmatpush3.xpose.msk.msra.mxu0 %vm504_vm2, %v675_v20 }
 0x209   : > { %1184 = vmatprep.subr.bf16.mxu0 %v1520_v0 }
 0x20b   : > { %v673_v21 = vpop.permute.xlu0 %672 }
 0x20c   : > { %1154 = vmatmul.mubr.msk.f32.vlgmr.msra.gmra.mrb[2].mxu0 %vm504_vm2, %v673_v21 }
 0x20d   : > { %1169 = vmatprep.mubr.msk.f32.mxu0 %vm1521_vm0, %v1522_v1  ;;  %1186 = vmatpush3.bf16.msra.mxu0 %v1185_v55 }
 0x20e   : > { %1187 = vmatprep.subr.bf16.mxu0 %v1520_v0 }
 0x211   : > { %1189 = vmatpush3.bf16.msra.mxu0 %v1188_v57 }
 0x26b   : > { %v577_v22 = vpop.f32.mrb[2].mxu1 }
 0x26c   : > { %v1145_v23 = vpop.f32.mrb[3].mxu1  ;;  %v582_v24 = vsel %vm581_vm3, %v577_v22, -inf }
 0x26d   : > { %583 = vmax.xlane.f32.xlu1 %v582_v24 }
 0x2df   : > { %v746_v25 = vpop.f32.mrb[2].mxu0 }
 0x2e0   : > { %v1155_v26 = vpop.f32.mrb[3].mxu0  ;;  %v750_v27 = vsel %vm581_vm3, %v746_v25, -inf }
 0x2e1   : > { %751 = vmax.xlane.f32.xlu1 %v750_v27 }
 0x2f2   : > { %596 = vrot.lane.b32.xlu1 %v500_v16, %s1524_s11 }
 0x2fa   : > { %v584_v28 = vpop.xlane.xlu1 %583 }
 0x2fb   : > { %v585_v29 = vsub.f32 %v577_v22, %v584_v28 }
 0x2fd   : > { %v586_v30 = vmul.f32 1.442695, %v585_v29 }
 0x2ff   : > { %1281 = vpow2.f32 %v586_v30 }
 0x309   : > { %v1282_v31 = vpop.eup %1281 }
 0x30a   : > { %v588_v32 = vsel %vm581_vm3, %v1282_v31, 0.0 }
 0x30b   : > { %589 = vadd.xlane.f32.xlu0 %v588_v32 }
 0x36e   : > { %v752_v33 = vpop.xlane.xlu1 %751 }
 0x36f   : > { %v753_v34 = vsub.f32 %v746_v25, %v752_v33 }
 0x371   : > { %v754_v35 = vmul.f32 1.442695, %v753_v34 }
 0x372   : > { %v597_v36 = vpop.permute.xlu1 %596 }
 0x373   : > { %1283 = vpow2.f32 %v754_v35  ;;  %1147 = vmatpush3.msra.mxu1 %v597_v36 }
 0x374   : > { %1156 = vmatprep.subr.mxu1 %v1522_v1 }
 0x37d   : > { %v1284_v37 = vpop.eup %1283 }
 0x37e   : > { %v756_v38 = vsel %vm581_vm3, %v1284_v37, 0.0 }
 0x37f   : > { %757 = vadd.xlane.f32.xlu1 %v756_v38 }
 0x390   : > { %764 = vrot.lane.b32.xlu1 %v500_v16, %s1525_s30 }
 0x398   : > { %v590_v39 = vpop.xlane.xlu0 %589 }
 0x399   : > { %1285 = vrcp.f32 %v590_v39 }
 0x3a3   : > { %v1286_v40 = vpop.eup %1285 }
 0x3a4   : > { %v592_v41 = vmul.f32 %v1286_v40, %v590_v39 }
 0x3a6   : > { %v593_v42 = vsub.f32 2.0, %v592_v41 }
 0x3a8   : > { %v594_v43 = vmul.f32 %v1286_v40, %v593_v42 }
 0x3aa   : > { %v595_v44 = vmul.f32 %v1282_v31, %v594_v43 }
 0x3ac   : > { %1149 = vmatmul.mubr.msk.f32.vlgmr.msra.gmra.mrb[4].mxu1 %vm581_vm3, %v595_v44 }
 0x3ad   : > { %1158 = vmatprep.mubr.msk.f32.mxu1 %vm1521_vm0, %v1522_v1  ;;  %v1090_v1 = vld [vmem:[%s1916_s5] ss:$0 sm:$0xff] }
 0x40c   : > { %v758_v45 = vpop.xlane.xlu1 %757 }
 0x40d   : > { %1287 = vrcp.f32 %v758_v45 }
 0x410   : > { %v765_v46 = vpop.permute.xlu1 %764 }
 0x411   : > { %1157 = vmatpush3.msra.mxu1 %v765_v46 }
 0x417   : > { %v1288_v47 = vpop.eup %1287 }
 0x418   : > { %v760_v48 = vmul.f32 %v1288_v47, %v758_v45 }
 0x41a   : > { %v761_v49 = vsub.f32 2.0, %v760_v48 }
 0x41c   : > { %v762_v50 = vmul.f32 %v1288_v47, %v761_v49 }
 0x41e   : > { %v763_v51 = vmul.f32 %v1284_v37, %v762_v50 }
 0x420   : > { %1159 = vmatmul.mubr.msk.f32.vlgmr.msra.gmra.mrb[6].mxu1 %vm581_vm3, %v763_v51 }
 0x47f   : > { %v668_v58 = vpop.f32.mrb[4].mxu1 }
 0x480   : > { %v1150_v59 = vpop.f32.mrb[5].mxu1 }
 0x4f3   : > { %v836_v60 = vpop.f32.mrb[6].mxu1 }
 0x4f4   : > { %841 = vrot.lane.b32.xlu1 %v836_v60, %s1526_s16  ;;  %v1160_v61 = vpop.f32.mrb[7].mxu1 }
 0x566   : > { %v842_v62 = vpop.permute.xlu1 %841 }
 0x567   : > { %v844_v63 = vsel %vm504_vm2, %v668_v58, %v842_v62 }
 0x568   : > { %1170 = vmatmul.mubr.msk.f32.vlgmr.msra.gmra.mrb[4].mxu0 %vm353_vm1, %v844_v63 }
 0x63b   : > { %v925_v0 = vpop.f32.mrb[4].mxu0 }
 0x63c   : > { %v926_v2 = vadd.f32 %v1090_v1, %v925_v0  ;;  %v1171_v3 = vpop.f32.mrb[5].mxu0 }
 0x63e   : > { %929 = vst.msk [vmem:[%s346_s12] sm:$0xff] %vm353_vm1, %v926_v2 }
 0x63f   : > { %1446 = shalt.err (!%p1443_p10)
}
 0x640   : > { %s1447_s2 = scalar_lea.hbm %s1866_s9, 128  ;;  %s1451_s11 = scalar_lea.hbm %s1917_s6, 256 }
 0x641   : > { %p1448_p13 = scmp.ne.s32.totalorder %s1866_s9, %s1447_s2  ;;  %p1452_p9 = scmp.lt.u32.totalorder %s1866_s9, %s1917_s6 }
 0x642   : > { %p1453_p3 = scmp.lt.u32.totalorder %s1451_s11, %s1447_s2  ;;  %p1455_p12 = scmp.lt.u32.totalorder %s1447_s2, %s1866_s9 }
 0x643   : > { %p1449_p5 = pnand %p1448_p13, %p1942_p1 }
 0x644   : > { %p1454_p7 = por %p1453_p3, %p1452_p9 }
 0x645   : > { %p1450_p11 = pneg %p1449_p5 }
 0x646   : > { %p1456_p2 = por %p1455_p12, %p1454_p7 }
 0x648   : > { %p1457_p4 = pnand %p1456_p2, %p1450_p11 }
 0x64a   : > { %1460 = shalt.err (!%p1457_p4)
}
 0x64b   : > { %1206 = dma.vmem_to_hbm [thread:$0]  (%p1942_p1), %s1868_s19, 128, %s1866_s9, %s931_s20  }
 0x64c PF: > { %s956_s17 = sand.u32 1, %s1499_s21   ;;  %p1943_p0 = scmp.ne.s32.totalorder %s1926_s28, 0 }
 0x64d   : > { %p1944_p8 = scmp.ge.s32.totalorder %s1511_s24, 2  ;;  %s957_s10 = scalar_lea.sflag [#allocation4], %s956_s17 }
 0x64f   : > { %p1226_p6 = pnand %p1944_p8, %p1943_p0 }
 0x651   : > { %1494 = dma.done.wait (!%p1226_p6), %s957_s10, 128  }
 0x652   : > { %1496 = vsyncadd (!%p1226_p6), %s957_s10, 4294967168  ;;  %p23_p10 = scmp.ge.s32.totalorder %s1703_s18, 4   ;;  %s1945_s21 = smov %s1503_s22 }
 0x653   : > { %s1946_s22 = smov %s1507_s23  ;;  %s1947_s23 = smov %s1713_s14 }
 0x654   : > { %s1948_s24 = smov %s1703_s18  ;;  %25 = sbr.rel (!%p23_p10) target bundleno = 12 (0xc), region = 114 }
 0x65b   :  { %962 = vsyncpa [#allocation3], 1 }
 0x65c   :  { %964 = vsyncpa [#allocation3 + $0x1], 1 }
 0x65d   :  { %965 = vsyncpa [#allocation6], 1 }
 0x65e   :  { %967 = vsyncpa [#allocation6 + $0x1], 1 }
 0x65f   :  { %968 = vsyncpa [#allocation9], 1 }
 0x660   :  { %969 = vsyncpa [#allocation4], 1 }
 0x661   :  { %971 = vsyncpa [#allocation4 + $0x1], 1 }

</bundles_post_ra>
